<compile_context>
chip_gen: v7x
topology: tpu7x:2x2x1
jax: 0.10.0
libtpu: 0.0.40
codegen_flags: <defaults>
</compile_context>

<pallas_src>
import functools

import jax
import jax.numpy as jnp
from jax.experimental import pallas as pl
from jax.experimental.pallas import tpu as pltpu

IN_FEATURES = 64 * 12   # 768
HIDDEN = 256
OUT_FEATURES = 1


def _round_up(x, m):
    return ((x + m - 1) // m) * m


def _qnet_kernel(x_ref, w1_ref, b1_ref, w2_ref, b2_ref, o_ref, *, compute_dtype):
    # x_ref:  (TILE_B, 768)   w1_ref: (768, 256)   b1_ref: (1, 256)
    # w2_ref: (1, 256)  (second Linear weight stored as a row)
    # b2_ref: (1, 1) scalar in SMEM         o_ref: (TILE_B, 1)
    x = x_ref[...].astype(compute_dtype)
    w1 = w1_ref[...].astype(compute_dtype)
    # 768x256 GEMM on the MXU with f32 accumulation.
    h = jnp.dot(x, w1, preferred_element_type=jnp.float32)
    h = jnp.maximum(h + b1_ref[...], 0.0)          # bias + ReLU in f32 on the VPU
    # Second Linear (256 -> 1): VPU multiply + XLU lane reduction; MXU stays free.
    y = jnp.sum(h * w2_ref[...], axis=-1, keepdims=True) + b2_ref[0, 0]
    o_ref[...] = y.astype(o_ref.dtype)


def qnet_forward(x, w1, b1, w2_row, b2, *, tile_b=256, compute_dtype=jnp.float32):
    """y = relu(x @ w1 + b1) @ w2_row.T + b2, fused in a single Pallas kernel.

    x: (B, 768); w1: (768, 256); b1: (1, 256); w2_row: (1, 256); b2: (1, 1).
    """
    B = x.shape[0]
    # Tile a multiple of 16: covers both the f32 (8,128) and bf16 (16,128) sublane tiles.
    tb = min(_round_up(tile_b, 16), _round_up(B, 16))
    b_pad = _round_up(B, tb)
    if b_pad != B:
        x = jnp.pad(x, ((0, b_pad - B), (0, 0)))
    num_tiles = b_pad // tb

    kernel = functools.partial(_qnet_kernel, compute_dtype=compute_dtype)

    out = pl.pallas_call(
        kernel,
        out_shape=jax.ShapeDtypeStruct((b_pad, OUT_FEATURES), jnp.float32),
        grid_spec=pl.GridSpec(
            grid=(num_tiles,),
            in_specs=[
                # Streamed, double-buffered activation tile.
                pl.BlockSpec((tb, IN_FEATURES), lambda i: (i, 0)),
                # VMEM-resident weights / bias: same block every step -> no re-DMA.
                pl.BlockSpec((IN_FEATURES, HIDDEN), lambda i: (0, 0)),
                pl.BlockSpec((1, HIDDEN), lambda i: (0, 0)),
                pl.BlockSpec((1, HIDDEN), lambda i: (0, 0)),
                # Scalar b2 lives in SMEM (no padded (8,128) VMEM tile, no DMA per stage).
                pl.BlockSpec(memory_space=pltpu.MemorySpace.SMEM),
            ],
            out_specs=pl.BlockSpec((tb, OUT_FEATURES), lambda i: (i, 0)),
        ),
        compiler_params=pltpu.CompilerParams(
            # Batch tiles are independent -> shard across both TensorCores on v7x.
            dimension_semantics=("parallel",),
            # 2x x-tile + 2x weights + out + headroom; well under every chip's scope.
            vmem_limit_bytes=32 * 1024 * 1024,
        ),
    )(x, w1, b1, w2_row, b2)
    return out[:B]


def init_params(key):
    # Deterministic init mimicking PyTorch nn.Linear default:
    # uniform(-1/sqrt(fan_in), 1/sqrt(fan_in)). w2 is stored as a (1, HIDDEN) row.
    k1, k2, k3, k4 = jax.random.split(key, 4)
    bound1 = 1.0 / jnp.sqrt(float(IN_FEATURES))
    bound2 = 1.0 / jnp.sqrt(float(HIDDEN))
    w1 = jax.random.uniform(k1, (IN_FEATURES, HIDDEN), jnp.float32, -bound1, bound1)
    b1 = jax.random.uniform(k2, (1, HIDDEN), jnp.float32, -bound1, bound1)
    w2_row = jax.random.uniform(k3, (1, HIDDEN), jnp.float32, -bound2, bound2)
    b2 = jax.random.uniform(k4, (1, OUT_FEATURES), jnp.float32, -bound2, bound2)
    return w1, b1, w2_row, b2


def _reference(x, w1, b1, w2_row, b2):
    hi = jax.lax.Precision.HIGHEST
    h = jnp.maximum(jnp.dot(x, w1, precision=hi) + b1, 0.0)
    return jnp.dot(h, w2_row.T, precision=hi) + b2


if __name__ == "__main__":
    key = jax.random.PRNGKey(0)
    pkey, xkey1, xkey2 = jax.random.split(key, 3)
    w1, b1, w2_row, b2 = init_params(pkey)

    # --- check 1: small batch, single tile, f32 end-to-end ---------------------
    B1 = 8
    x1 = jax.random.normal(xkey1, (B1, IN_FEATURES), jnp.float32)
    out1 = jax.block_until_ready(qnet_forward(x1, w1, b1, w2_row, b2))
    ref1 = _reference(x1, w1, b1, w2_row, b2)
    assert out1.shape == (B1, OUT_FEATURES)
    assert jnp.allclose(out1, ref1, atol=1e-4, rtol=1e-4), "f32 single-tile mismatch"

    # --- check 2: ragged batch over several tiles (pad + slice path), f32 ------
    B2 = 40  # not a multiple of tile_b -> exercises padding, multi-tile grid
    x2 = jax.random.normal(xkey2, (B2, IN_FEATURES), jnp.float32)
    out2 = jax.block_until_ready(qnet_forward(x2, w1, b1, w2_row, b2, tile_b=16))
    ref2 = _reference(x2, w1, b1, w2_row, b2)
    assert out2.shape == (B2, OUT_FEATURES)
    assert jnp.allclose(out2, ref2, atol=1e-4, rtol=1e-4), "f32 multi-tile mismatch"

    # --- check 3: bf16 MXU inputs (f32 accumulation + f32 epilogue) -------------
    out3 = jax.block_until_ready(
        qnet_forward(x2.astype(jnp.bfloat16), w1.astype(jnp.bfloat16),
                     b1, w2_row, b2, tile_b=16, compute_dtype=jnp.bfloat16))
    assert out3.shape == (B2, OUT_FEATURES)
    assert jnp.allclose(out3, ref2, atol=3e-2, rtol=3e-2), "bf16 mismatch vs f32 ref"

    # Note: for tiny-batch serving (B~8) the wall clock is dominated by the ~768 KiB
    # w1 DMA + launch overhead; amortize by batching requests per call or keeping
    # weights resident across calls (cross-call prefetch / input_output_aliases).
    print("KERNEL_OK")
</pallas_src>

<mosaic_0001>
module attributes {stable_mosaic.version = 11 : i64} {
  func.func @_qnet_kernel(%arg0: i32, %arg1: memref<16x768xf32, #tpu.memory_space<vmem>>, %arg2: memref<768x256xf32, #tpu.memory_space<vmem>>, %arg3: memref<1x256xf32, #tpu.memory_space<vmem>>, %arg4: memref<1x256xf32, #tpu.memory_space<vmem>>, %arg5: memref<1x1xf32, #tpu.memory_space<smem>>, %arg6: memref<16x1xf32, #tpu.memory_space<vmem>>) attributes {dimension_semantics = [#tpu.dimension_semantics<parallel>], iteration_bounds = array<i64: 1>, scalar_prefetch = 0 : i64, scratch_operands = 0 : i64, tpu.core_type = #tpu.core_type<tc>, window_params = [{transform_indices = @transform_0, window_bounds = array<i64: 16, 768>}, {pipeline_mode = #tpu.pipeline_mode<synchronous>, transform_indices = @transform_1, window_bounds = array<i64: 768, 256>}, {pipeline_mode = #tpu.pipeline_mode<synchronous>, transform_indices = @transform_2, window_bounds = array<i64: 1, 256>}, {pipeline_mode = #tpu.pipeline_mode<synchronous>, transform_indices = @transform_3, window_bounds = array<i64: 1, 256>}, {transform_indices = @transform_4, window_bounds = array<i64: 1, 1>}, {transform_indices = @transform_5, window_bounds = array<i64: 16, 1>}]} {
    %c0 = arith.constant 0 : index
    %c0_0 = arith.constant 0 : index
    %0 = vector.load %arg1[%c0, %c0_0] : memref<16x768xf32, #tpu.memory_space<vmem>>, vector<16x768xf32>
    %c0_1 = arith.constant 0 : index
    %c0_2 = arith.constant 0 : index
    %1 = vector.load %arg2[%c0_1, %c0_2] : memref<768x256xf32, #tpu.memory_space<vmem>>, vector<768x256xf32>
    %cst = arith.constant dense<0.000000e+00> : vector<16x256xf32>
    %2 = tpu.matmul %0, %1, %cst {dimension_numbers = #tpu.dot_dimension_numbers<[1], [0], [0], [1], [0, 0, 1, 1], [], []>} : vector<16x768xf32>, vector<768x256xf32>, vector<16x256xf32> -> vector<16x256xf32>
    %c0_3 = arith.constant 0 : index
    %c0_4 = arith.constant 0 : index
    %3 = vector.load %arg3[%c0_3, %c0_4] : memref<1x256xf32, #tpu.memory_space<vmem>>, vector<1x256xf32>
    %4 = vector.broadcast %3 : vector<1x256xf32> to vector<16x256xf32>
    %5 = arith.addf %2, %4 : vector<16x256xf32>
    %cst_5 = arith.constant 0.000000e+00 : f32
    %6 = vector.broadcast %cst_5 : f32 to vector<16x256xf32>
    %7 = arith.maximumf %5, %6 : vector<16x256xf32>
    %c0_6 = arith.constant 0 : index
    %c0_7 = arith.constant 0 : index
    %8 = vector.load %arg4[%c0_6, %c0_7] : memref<1x256xf32, #tpu.memory_space<vmem>>, vector<1x256xf32>
    %9 = vector.broadcast %8 : vector<1x256xf32> to vector<16x256xf32>
    %10 = arith.mulf %7, %9 : vector<16x256xf32>
    %cst_8 = arith.constant dense<0.000000e+00> : vector<16xf32>
    %11 = vector.multi_reduction <add>, %10, %cst_8 [1] : vector<16x256xf32> to vector<16xf32>
    %12 = vector.shape_cast %11 : vector<16xf32> to vector<16x1xf32>
    %c0_9 = arith.constant 0 : index
    %c0_10 = arith.constant 0 : index
    %13 = memref.load %arg5[%c0_9, %c0_10] : memref<1x1xf32, #tpu.memory_space<smem>>
    %14 = vector.broadcast %13 : f32 to vector<16x1xf32>
    %15 = arith.addf %12, %14 : vector<16x1xf32>
    %c0_11 = arith.constant 0 : index
    %c0_12 = arith.constant 0 : index
    %16 = vector.load %arg6[%c0_11, %c0_12] : memref<16x1xf32, #tpu.memory_space<vmem>>, vector<16x1xf32>
    tpu.vector_store %arg6[%c0_11, %c0_12], %15 {strides = array<i32>} : memref<16x1xf32, #tpu.memory_space<vmem>>, vector<16x1xf32>,
    return
  }
  func.func @transform_0(%arg0: i32) -> (i32, i32) {
    %c0_i32 = arith.constant 0 : i32
    %c0_i32_0 = arith.constant 0 : i32
    return %arg0, %c0_i32 : i32, i32
  }
  func.func @transform_1(%arg0: i32) -> (i32, i32) {
    %c0_i32 = arith.constant 0 : i32
    %c0_i32_0 = arith.constant 0 : i32
    %c0_i32_1 = arith.constant 0 : i32
    return %c0_i32, %c0_i32_0 : i32, i32
  }
  func.func @transform_2(%arg0: i32) -> (i32, i32) {
    %c0_i32 = arith.constant 0 : i32
    %c0_i32_0 = arith.constant 0 : i32
    %c0_i32_1 = arith.constant 0 : i32
    return %c0_i32, %c0_i32_0 : i32, i32
  }
  func.func @transform_3(%arg0: i32) -> (i32, i32) {
    %c0_i32 = arith.constant 0 : i32
    %c0_i32_0 = arith.constant 0 : i32
    %c0_i32_1 = arith.constant 0 : i32
    return %c0_i32, %c0_i32_0 : i32, i32
  }
  func.func @transform_4(%arg0: i32) -> (i32, i32) {
    %c0_i32 = arith.constant 0 : i32
    %c0_i32_0 = arith.constant 0 : i32
    %c0_i32_1 = arith.constant 0 : i32
    return %c0_i32, %c0_i32_0 : i32, i32
  }
  func.func @transform_5(%arg0: i32) -> (i32, i32) {
    %c0_i32 = arith.constant 0 : i32
    %c0_i32_0 = arith.constant 0 : i32
    return %arg0, %c0_i32 : i32, i32
  }
}

</mosaic_0001>

<bundles_post_ra>
// kernel: tpu_custom_call.1
= control target key start
LH: loop header
LB: loop body
LE: loop exit
PB: predicated region body
PF: predicated region fallthrough
CT: control target
= control target key end

     0   :  { %11 = vsyncpa [#allocation4], 0  ;;  %s900_s0 = inlined_call_operand.hbm [shape: f32[16,768], index: 0, kind: input, shape index: {}]   ;;  %s901_s1 = inlined_call_operand.hbm [shape: f32[768,256], index: 1, kind: input, shape index: {}]   ;;  %s902_s2 = inlined_call_operand.vmem [shape: f32[1,256], index: 2, kind: input, shape index: {}]   ;;  %s903_s3 = inlined_call_operand.vmem [shape: f32[1,256], index: 3, kind: input, shape index: {}]   ;;  %s904_s4 = inlined_call_operand.<no memory space> [shape: f32[1,1], index: 4, kind: input, shape index: {}]   ;;  %s905_s5 = inlined_call_operand.vmem [shape: f32[16,1], index: 5, kind: output, shape index: {}]  }
   0x1   :  { %12 = vsyncpa [#allocation6], 0  ;;  %s825_s18 = smov [#allocation3]   ;;  %s777_s22 = scalar_lea.hbm %s900_s0, 1536 }
   0x2   :  { %s18_s19 = sshll.u32 %s825_s18, 4  ;;  %p778_p0 = scmp.ne.s32.totalorder %s900_s0, %s777_s22  ;;  %s19_s19 = int_to_ptr.vmem [resolvable:$true] %s18_s19 }
   0x3   :  { %p781_p1 = scmp.lt.u32.totalorder %s777_s22, %s900_s0 }
   0x5   :  { %p783_p2 = pnand %p781_p1, %p778_p0 }
   0x7   :  { %786 = shalt.err (!%p783_p2)
}
   0x8   :  { %s787_s27 = scalar_lea.vmem %s19_s19, 1536  ;;  %p792_p4 = scmp.lt.s32.totalorder %s19_s19, %s19_s19 }
   0x9   :  { %p788_p3 = scmp.ne.s32.totalorder %s19_s19, %s787_s27  ;;  %p793_p5 = scmp.lt.s32.totalorder %s787_s27, %s787_s27 }
   0xb   :  { %p794_p6 = por %p793_p5, %p792_p4 }
   0xd   :  { %p795_p7 = pnand %p794_p6, %p788_p3 }
   0xf   :  { %798 = shalt.err (!%p795_p7)
}
  0x10   :  { %s826_s28 = smov 768   ;;  %s827_s29 = smov 48  }
  0x11   :  { %24 = dma.hbm_to_vmem [thread:$0]  %s900_s0, 1536, %s19_s19, [#allocation4], %s826_s28, %s826_s28, %s827_s29  }
  0x12   :  { %s828_s7 = smov [#allocation5]   ;;  %s799_s11 = scalar_lea.hbm %s901_s1, 24576 }
  0x13   :  { %s30_s8 = sshll.u32 %s828_s7, 4  ;;  %p800_p8 = scmp.ne.s32.totalorder %s901_s1, %s799_s11  ;;  %s31_s8 = int_to_ptr.vmem [resolvable:$true] %s30_s8 }
  0x14   :  { %p803_p9 = scmp.lt.u32.totalorder %s799_s11, %s901_s1 }
  0x16   :  { %p805_p10 = pnand %p803_p9, %p800_p8 }
  0x18   :  { %808 = shalt.err (!%p805_p10)
}
  0x19   :  { %s809_s16 = scalar_lea.vmem %s31_s8, 24576  ;;  %p814_p12 = scmp.lt.s32.totalorder %s31_s8, %s31_s8 }
  0x1a   :  { %p810_p11 = scmp.ne.s32.totalorder %s31_s8, %s809_s16  ;;  %p815_p13 = scmp.lt.s32.totalorder %s809_s16, %s809_s16 }
  0x1c   :  { %p816_p0 = por %p815_p13, %p814_p12 }
  0x1e   :  { %p817_p1 = pnand %p816_p0, %p810_p11 }
  0x20   :  { %820 = shalt.err (!%p817_p1)
}
  0x21   :  { %s829_s0 = smov 256   ;;  %s830_s17 = smov 16  }
  0x22   :  { %36 = dma.hbm_to_vmem [thread:$0]  %s901_s1, 24576, %s31_s8, [#allocation6], %s829_s0, %s829_s0, %s830_s17  }
  0x23   :  { %821 = dma.done.wait [#allocation4], 1536  }
  0x24   :  { %822 = vsyncadd [#allocation4], 4294965760 }
  0x25   :  { %823 = dma.done.wait [#allocation6], 24576  }
  0x26   :  { %824 = vsyncadd [#allocation6], 4294942720  ;;  %v62_v0 = vld [vmem:[#allocation5 + $0x8] sm:$0xff]  ;;  %v64_v1 = vld [vmem:[#allocation5 + $0x18] sm:$0xff]  ;;  %vm526_vm0 = vcmask 7168  }
  0x27   :  { %v126_v2 = vld [vmem:[#allocation5 + $0x208] sm:$0xff]  ;;  %v535_v3 = vpack.c.bf16 %v64_v1, %v62_v0  ;;  %v128_v4 = vld [vmem:[#allocation5 + $0x218] sm:$0xff]  ;;  %v61_v5 = vld [vmem:[#allocation5] sm:$0xff] }
  0x28   :  { %v63_v6 = vld [vmem:[#allocation5 + $0x10] sm:$0xff]  ;;  %v599_v7 = vpack.c.bf16 %v128_v4, %v126_v2  ;;  %v125_v9 = vld [vmem:[#allocation5 + $0x200] sm:$0xff]  ;;  %v66_v11 = vld [vmem:[#allocation5 + $0x28] sm:$0xff] }
  0x29   :  { %v537_v8 = vpack.c.bf16 %v63_v6, %v61_v5  ;;  %v127_v10 = vld [vmem:[#allocation5 + $0x210] sm:$0xff]  ;;  %536 = vmatprep.subr.bf16.mxu1 %v535_v3  ;;  %v68_v13 = vld [vmem:[#allocation5 + $0x38] sm:$0xff]  ;;  %v130_v14 = vld [vmem:[#allocation5 + $0x228] sm:$0xff] }
  0x2a   :  { %v601_v12 = vpack.c.bf16 %v127_v10, %v125_v9  ;;  %v132_v15 = vld [vmem:[#allocation5 + $0x238] sm:$0xff]  ;;  %600 = vmatprep.subr.bf16.mxu0 %v599_v7  ;;  %v539_v16 = vpack.c.bf16 %v68_v13, %v66_v11  ;;  %v65_v18 = vld [vmem:[#allocation5 + $0x20] sm:$0xff]  ;;  %v67_v19 = vld [vmem:[#allocation5 + $0x30] sm:$0xff] }
  0x2b   :  { %538 = vmatpush1.bf16.msra.mxu1 %v537_v8  ;;  %v603_v17 = vpack.c.bf16 %v132_v15, %v130_v14  ;;  %v129_v20 = vld [vmem:[#allocation5 + $0x220] sm:$0xff]  ;;  %v541_v21 = vpack.c.bf16 %v67_v19, %v65_v18  ;;  %v131_v22 = vld [vmem:[#allocation5 + $0x230] sm:$0xff]  ;;  %v70_v23 = vld [vmem:[#allocation5 + $0x48] sm:$0xff] }
  0x2c   :  { %602 = vmatpush1.bf16.msra.mxu0 %v601_v12  ;;  %v72_v24 = vld [vmem:[#allocation5 + $0x58] sm:$0xff]  ;;  %540 = vmatprep.subr.bf16.mxu1 %v539_v16  ;;  %v605_v25 = vpack.c.bf16 %v131_v22, %v129_v20  ;;  %v134_v27 = vld [vmem:[#allocation5 + $0x248] sm:$0xff]  ;;  %v69_v29 = vld [vmem:[#allocation5 + $0x40] sm:$0xff] }
  0x2d   :  { %604 = vmatprep.subr.bf16.mxu0 %v603_v17  ;;  %v543_v26 = vpack.c.bf16 %v72_v24, %v70_v23  ;;  %v136_v28 = vld [vmem:[#allocation5 + $0x258] sm:$0xff]  ;;  %v71_v31 = vld [vmem:[#allocation5 + $0x50] sm:$0xff]  ;;  %v133_v32 = vld [vmem:[#allocation5 + $0x240] sm:$0xff] }
  0x2e   :  { %v607_v30 = vpack.c.bf16 %v136_v28, %v134_v27  ;;  %v135_v33 = vld [vmem:[#allocation5 + $0x250] sm:$0xff]  ;;  %v545_v34 = vpack.c.bf16 %v71_v31, %v69_v29  ;;  %v74_v35 = vld [vmem:[#allocation5 + $0x68] sm:$0xff]  ;;  %v76_v36 = vld [vmem:[#allocation5 + $0x78] sm:$0xff] }
  0x2f   :  { %542 = vmatpush1.bf16.msra.mxu1 %v541_v21  ;;  %v138_v37 = vld [vmem:[#allocation5 + $0x268] sm:$0xff]  ;;  %v609_v38 = vpack.c.bf16 %v135_v33, %v133_v32  ;;  %v547_v39 = vpack.c.bf16 %v76_v36, %v74_v35  ;;  %v140_v40 = vld [vmem:[#allocation5 + $0x278] sm:$0xff]  ;;  %v73_v41 = vld [vmem:[#allocation5 + $0x60] sm:$0xff] }
  0x30   :  { %606 = vmatpush1.bf16.msra.mxu0 %v605_v25  ;;  %544 = vmatprep.subr.bf16.mxu1 %v543_v26  ;;  %v75_v42 = vld [vmem:[#allocation5 + $0x70] sm:$0xff]  ;;  %v611_v43 = vpack.c.bf16 %v140_v40, %v138_v37  ;;  %v137_v44 = vld [vmem:[#allocation5 + $0x260] sm:$0xff]  ;;  %v78_v46 = vld [vmem:[#allocation5 + $0x88] sm:$0xff] }
  0x31   :  { %608 = vmatprep.subr.bf16.mxu0 %v607_v30  ;;  %v139_v45 = vld [vmem:[#allocation5 + $0x270] sm:$0xff]  ;;  %v80_v47 = vld [vmem:[#allocation5 + $0x98] sm:$0xff]  ;;  %v142_v48 = vld [vmem:[#allocation5 + $0x288] sm:$0xff]  ;;  %v549_v50 = vpack.c.bf16 %v75_v42, %v73_v41 }
  0x32   :  { %v144_v49 = vld [vmem:[#allocation5 + $0x298] sm:$0xff]  ;;  %v613_v51 = vpack.c.bf16 %v139_v45, %v137_v44  ;;  %v551_v52 = vpack.c.bf16 %v80_v47, %v78_v46  ;;  %v77_v53 = vld [vmem:[#allocation5 + $0x80] sm:$0xff]  ;;  %v79_v54 = vld [vmem:[#allocation5 + $0x90] sm:$0xff] }
  0x33   :  { %546 = vmatpush1.bf16.msra.mxu1 %v545_v34  ;;  %v141_v55 = vld [vmem:[#allocation5 + $0x280] sm:$0xff]  ;;  %v615_v56 = vpack.c.bf16 %v144_v49, %v142_v48  ;;  %v143_v57 = vld [vmem:[#allocation5 + $0x290] sm:$0xff]  ;;  %v82_v58 = vld [vmem:[#allocation5 + $0xa8] sm:$0xff]  ;;  %v553_v62 = vpack.c.bf16 %v79_v54, %v77_v53 }
  0x34   :  { %610 = vmatpush1.bf16.msra.mxu0 %v609_v38  ;;  %548 = vmatprep.subr.bf16.mxu1 %v547_v39  ;;  %v84_v59 = vld [vmem:[#allocation5 + $0xb8] sm:$0xff]  ;;  %v146_v60 = vld [vmem:[#allocation5 + $0x2a8] sm:$0xff]  ;;  %v617_v63 = vpack.c.bf16 %v143_v57, %v141_v55  ;;  %v81_v1 = vld [vmem:[#allocation5 + $0xa0] sm:$0xff] }
  0x35   :  { %612 = vmatprep.subr.bf16.mxu0 %v611_v43  ;;  %v148_v61 = vld [vmem:[#allocation5 + $0x2b8] sm:$0xff]  ;;  %v555_v0 = vpack.c.bf16 %v84_v59, %v82_v58  ;;  %v83_v2 = vld [vmem:[#allocation5 + $0xb0] sm:$0xff]  ;;  %v145_v3 = vld [vmem:[#allocation5 + $0x2a0] sm:$0xff] }
  0x36   :  { %v619_v4 = vpack.c.bf16 %v148_v61, %v146_v60  ;;  %v147_v5 = vld [vmem:[#allocation5 + $0x2b0] sm:$0xff]  ;;  %v86_v6 = vld [vmem:[#allocation5 + $0xc8] sm:$0xff]  ;;  %v88_v7 = vld [vmem:[#allocation5 + $0xd8] sm:$0xff]  ;;  %v557_v10 = vpack.c.bf16 %v83_v2, %v81_v1 }
  0x37   :  { %550 = vmatpush1.bf16.msra.mxu1 %v549_v50  ;;  %v150_v8 = vld [vmem:[#allocation5 + $0x2c8] sm:$0xff]  ;;  %v152_v9 = vld [vmem:[#allocation5 + $0x2d8] sm:$0xff]  ;;  %v621_v11 = vpack.c.bf16 %v147_v5, %v145_v3  ;;  %v559_v12 = vpack.c.bf16 %v88_v7, %v86_v6  ;;  %v85_v13 = vld [vmem:[#allocation5 + $0xc0] sm:$0xff] }
  0x38   :  { %614 = vmatpush1.bf16.msra.mxu0 %v613_v51  ;;  %552 = vmatprep.subr.bf16.mxu1 %v551_v52  ;;  %v87_v14 = vld [vmem:[#allocation5 + $0xd0] sm:$0xff]  ;;  %v149_v15 = vld [vmem:[#allocation5 + $0x2c0] sm:$0xff]  ;;  %v623_v16 = vpack.c.bf16 %v152_v9, %v150_v8  ;;  %v90_v18 = vld [vmem:[#allocation5 + $0xe8] sm:$0xff] }
  0x39   :  { %616 = vmatprep.subr.bf16.mxu0 %v615_v56  ;;  %v151_v17 = vld [vmem:[#allocation5 + $0x2d0] sm:$0xff]  ;;  %v92_v19 = vld [vmem:[#allocation5 + $0xf8] sm:$0xff]  ;;  %v154_v20 = vld [vmem:[#allocation5 + $0x2e8] sm:$0xff]  ;;  %v561_v22 = vpack.c.bf16 %v87_v14, %v85_v13 }
  0x3a   :  { %v156_v21 = vld [vmem:[#allocation5 + $0x2f8] sm:$0xff]  ;;  %v625_v23 = vpack.c.bf16 %v151_v17, %v149_v15  ;;  %v563_v24 = vpack.c.bf16 %v92_v19, %v90_v18  ;;  %v89_v25 = vld [vmem:[#allocation5 + $0xe0] sm:$0xff]  ;;  %v91_v26 = vld [vmem:[#allocation5 + $0xf0] sm:$0xff] }
  0x3b   :  { %554 = vmatpush1.bf16.msra.mxu1 %v553_v62  ;;  %v153_v27 = vld [vmem:[#allocation5 + $0x2e0] sm:$0xff]  ;;  %v627_v28 = vpack.c.bf16 %v156_v21, %v154_v20  ;;  %v155_v29 = vld [vmem:[#allocation5 + $0x2f0] sm:$0xff]  ;;  %v94_v30 = vld [vmem:[#allocation5 + $0x108] sm:$0xff]  ;;  %v565_v34 = vpack.c.bf16 %v91_v26, %v89_v25 }
  0x3c   :  { %618 = vmatpush1.bf16.msra.mxu0 %v617_v63  ;;  %556 = vmatprep.subr.bf16.mxu1 %v555_v0  ;;  %v96_v31 = vld [vmem:[#allocation5 + $0x118] sm:$0xff]  ;;  %v158_v32 = vld [vmem:[#allocation5 + $0x308] sm:$0xff]  ;;  %v629_v35 = vpack.c.bf16 %v155_v29, %v153_v27  ;;  %v93_v37 = vld [vmem:[#allocation5 + $0x100] sm:$0xff] }
  0x3d   :  { %620 = vmatprep.subr.bf16.mxu0 %v619_v4  ;;  %v160_v33 = vld [vmem:[#allocation5 + $0x318] sm:$0xff]  ;;  %v567_v36 = vpack.c.bf16 %v96_v31, %v94_v30  ;;  %v95_v38 = vld [vmem:[#allocation5 + $0x110] sm:$0xff]  ;;  %v157_v39 = vld [vmem:[#allocation5 + $0x300] sm:$0xff] }
  0x3e   :  { %v631_v40 = vpack.c.bf16 %v160_v33, %v158_v32  ;;  %v159_v41 = vld [vmem:[#allocation5 + $0x310] sm:$0xff]  ;;  %v98_v42 = vld [vmem:[#allocation5 + $0x128] sm:$0xff]  ;;  %v100_v43 = vld [vmem:[#allocation5 + $0x138] sm:$0xff]  ;;  %v569_v46 = vpack.c.bf16 %v95_v38, %v93_v37 }
  0x3f   :  { %558 = vmatpush1.bf16.msra.mxu1 %v557_v10  ;;  %v162_v44 = vld [vmem:[#allocation5 + $0x328] sm:$0xff]  ;;  %v164_v45 = vld [vmem:[#allocation5 + $0x338] sm:$0xff]  ;;  %v633_v47 = vpack.c.bf16 %v159_v41, %v157_v39  ;;  %v571_v48 = vpack.c.bf16 %v100_v43, %v98_v42  ;;  %v97_v49 = vld [vmem:[#allocation5 + $0x120] sm:$0xff] }
  0x40   :  { %622 = vmatpush1.bf16.msra.mxu0 %v621_v11  ;;  %560 = vmatprep.subr.bf16.mxu1 %v559_v12  ;;  %v99_v50 = vld [vmem:[#allocation5 + $0x130] sm:$0xff]  ;;  %v161_v51 = vld [vmem:[#allocation5 + $0x320] sm:$0xff]  ;;  %v635_v52 = vpack.c.bf16 %v164_v45, %v162_v44  ;;  %v102_v54 = vld [vmem:[#allocation5 + $0x148] sm:$0xff] }
  0x41   :  { %624 = vmatprep.subr.bf16.mxu0 %v623_v16  ;;  %v163_v53 = vld [vmem:[#allocation5 + $0x330] sm:$0xff]  ;;  %v104_v55 = vld [vmem:[#allocation5 + $0x158] sm:$0xff]  ;;  %v166_v56 = vld [vmem:[#allocation5 + $0x348] sm:$0xff]  ;;  %v573_v58 = vpack.c.bf16 %v99_v50, %v97_v49 }
  0x42   :  { %v168_v57 = vld [vmem:[#allocation5 + $0x358] sm:$0xff]  ;;  %v637_v59 = vpack.c.bf16 %v163_v53, %v161_v51  ;;  %v575_v60 = vpack.c.bf16 %v104_v55, %v102_v54  ;;  %v101_v61 = vld [vmem:[#allocation5 + $0x140] sm:$0xff]  ;;  %v103_v62 = vld [vmem:[#allocation5 + $0x150] sm:$0xff] }
  0x43   :  { %562 = vmatpush1.bf16.msra.mxu1 %v561_v22  ;;  %v165_v63 = vld [vmem:[#allocation5 + $0x340] sm:$0xff]  ;;  %v639_v0 = vpack.c.bf16 %v168_v57, %v166_v56  ;;  %v167_v1 = vld [vmem:[#allocation5 + $0x350] sm:$0xff]  ;;  %v106_v2 = vld [vmem:[#allocation5 + $0x168] sm:$0xff]  ;;  %v577_v6 = vpack.c.bf16 %v103_v62, %v101_v61 }
  0x44   :  { %626 = vmatpush1.bf16.msra.mxu0 %v625_v23  ;;  %564 = vmatprep.subr.bf16.mxu1 %v563_v24  ;;  %v108_v3 = vld [vmem:[#allocation5 + $0x178] sm:$0xff]  ;;  %v170_v4 = vld [vmem:[#allocation5 + $0x368] sm:$0xff]  ;;  %v105_v7 = vld [vmem:[#allocation5 + $0x160] sm:$0xff]  ;;  %v641_v8 = vpack.c.bf16 %v167_v1, %v165_v63 }
  0x45   :  { %628 = vmatprep.subr.bf16.mxu0 %v627_v28  ;;  %v172_v5 = vld [vmem:[#allocation5 + $0x378] sm:$0xff]  ;;  %v579_v9 = vpack.c.bf16 %v108_v3, %v106_v2  ;;  %v107_v10 = vld [vmem:[#allocation5 + $0x170] sm:$0xff]  ;;  %v169_v11 = vld [vmem:[#allocation5 + $0x360] sm:$0xff] }
  0x46   :  { %v171_v12 = vld [vmem:[#allocation5 + $0x370] sm:$0xff]  ;;  %v643_v13 = vpack.c.bf16 %v172_v5, %v170_v4  ;;  %v110_v14 = vld [vmem:[#allocation5 + $0x188] sm:$0xff]  ;;  %v112_v15 = vld [vmem:[#allocation5 + $0x198] sm:$0xff]  ;;  %v581_v20 = vpack.c.bf16 %v107_v10, %v105_v7 }
  0x47   :  { %566 = vmatpush1.bf16.msra.mxu1 %v565_v34  ;;  %v50_v16 = vld [vmem:[#allocation3 + $0x8] sm:$0xff]  ;;  %v176_v18 = vld [vmem:[#allocation5 + $0x398] sm:$0xff]  ;;  %v645_v21 = vpack.c.bf16 %v171_v12, %v169_v11  ;;  %v583_v22 = vpack.c.bf16 %v112_v15, %v110_v14  ;;  %v109_v23 = vld [vmem:[#allocation5 + $0x180] sm:$0xff] }
  0x48   :  { %630 = vmatpush1.bf16.msra.mxu0 %v629_v35  ;;  %568 = vmatprep.subr.bf16.mxu1 %v567_v36  ;;  %v174_v17 = vld [vmem:[#allocation5 + $0x388] sm:$0xff]  ;;  %v52_v19 = vld [vmem:[#allocation3 + $0x18] sm:$0xff]  ;;  %v111_v24 = vld [vmem:[#allocation5 + $0x190] sm:$0xff] }
  0x49   :  { %632 = vmatprep.subr.bf16.mxu0 %v631_v40  ;;  %329 = vmatprep.mubr.f32.mxu1 %v50_v16  ;;  %v173_v25 = vld [vmem:[#allocation5 + $0x380] sm:$0xff]  ;;  %v647_v26 = vpack.c.bf16 %v176_v18, %v174_v17  ;;  %v175_v27 = vld [vmem:[#allocation5 + $0x390] sm:$0xff]  ;;  %v114_v28 = vld [vmem:[#allocation5 + $0x1a8] sm:$0xff]  ;;  %v585_v32 = vpack.c.bf16 %v111_v24, %v109_v23 }
  0x4a   :  { %406 = vmatprep.mubr.f32.mxu0 %v52_v19  ;;  %v116_v29 = vld [vmem:[#allocation5 + $0x1b8] sm:$0xff]  ;;  %v178_v30 = vld [vmem:[#allocation5 + $0x3a8] sm:$0xff]  ;;  %v649_v33 = vpack.c.bf16 %v175_v27, %v173_v25  ;;  %v113_v35 = vld [vmem:[#allocation5 + $0x1a0] sm:$0xff] }
  0x4b   :  { %570 = vmatpush1.bf16.msra.mxu1 %v569_v46  ;;  %v180_v31 = vld [vmem:[#allocation5 + $0x3b8] sm:$0xff]  ;;  %v587_v34 = vpack.c.bf16 %v116_v29, %v114_v28  ;;  %v115_v36 = vld [vmem:[#allocation5 + $0x1b0] sm:$0xff]  ;;  %v177_v37 = vld [vmem:[#allocation5 + $0x3a0] sm:$0xff] }
  0x4c   :  { %634 = vmatpush1.bf16.msra.mxu0 %v633_v47  ;;  %572 = vmatprep.subr.bf16.mxu1 %v571_v48  ;;  %v651_v38 = vpack.c.bf16 %v180_v31, %v178_v30  ;;  %v179_v39 = vld [vmem:[#allocation5 + $0x3b0] sm:$0xff]  ;;  %v118_v40 = vld [vmem:[#allocation5 + $0x1c8] sm:$0xff]  ;;  %v120_v41 = vld [vmem:[#allocation5 + $0x1d8] sm:$0xff]  ;;  %v589_v44 = vpack.c.bf16 %v115_v36, %v113_v35 }
  0x4d   :  { %636 = vmatprep.subr.bf16.mxu0 %v635_v52  ;;  %v182_v42 = vld [vmem:[#allocation5 + $0x3c8] sm:$0xff]  ;;  %v184_v43 = vld [vmem:[#allocation5 + $0x3d8] sm:$0xff]  ;;  %v653_v45 = vpack.c.bf16 %v179_v39, %v177_v37  ;;  %v591_v46 = vpack.c.bf16 %v120_v41, %v118_v40  ;;  %v117_v47 = vld [vmem:[#allocation5 + $0x1c0] sm:$0xff] }
  0x4e   :  { %v119_v48 = vld [vmem:[#allocation5 + $0x1d0] sm:$0xff]  ;;  %v181_v49 = vld [vmem:[#allocation5 + $0x3c0] sm:$0xff]  ;;  %v655_v50 = vpack.c.bf16 %v184_v43, %v182_v42  ;;  %v122_v52 = vld [vmem:[#allocation5 + $0x1e8] sm:$0xff] }
  0x4f   :  { %574 = vmatpush1.bf16.msra.mxu1 %v573_v58  ;;  %v183_v51 = vld [vmem:[#allocation5 + $0x3d0] sm:$0xff]  ;;  %v124_v53 = vld [vmem:[#allocation5 + $0x1f8] sm:$0xff]  ;;  %v186_v54 = vld [vmem:[#allocation5 + $0x3e8] sm:$0xff]  ;;  %v593_v56 = vpack.c.bf16 %v119_v48, %v117_v47 }
  0x50   :  { %638 = vmatpush1.bf16.msra.mxu0 %v637_v59  ;;  %576 = vmatprep.subr.bf16.mxu1 %v575_v60  ;;  %v188_v55 = vld [vmem:[#allocation5 + $0x3f8] sm:$0xff]  ;;  %v657_v57 = vpack.c.bf16 %v183_v51, %v181_v49  ;;  %v595_v58 = vpack.c.bf16 %v124_v53, %v122_v52  ;;  %v121_v59 = vld [vmem:[#allocation5 + $0x1e0] sm:$0xff]  ;;  %v123_v60 = vld [vmem:[#allocation5 + $0x1f0] sm:$0xff] }
  0x51   :  { %640 = vmatprep.subr.bf16.mxu0 %v639_v0  ;;  %v185_v61 = vld [vmem:[#allocation5 + $0x3e0] sm:$0xff]  ;;  %v659_v62 = vpack.c.bf16 %v188_v55, %v186_v54  ;;  %v187_v63 = vld [vmem:[#allocation5 + $0x3f0] sm:$0xff]  ;;  %v190_v0 = vld [vmem:[#allocation5 + $0x408] sm:$0xff]  ;;  %v597_v2 = vpack.c.bf16 %v123_v60, %v121_v59 }
  0x52   :  { %v192_v1 = vld [vmem:[#allocation5 + $0x418] sm:$0xff]  ;;  %v661_v3 = vpack.c.bf16 %v187_v63, %v185_v61  ;;  %v189_v5 = vld [vmem:[#allocation5 + $0x400] sm:$0xff]  ;;  %v194_v7 = vld [vmem:[#allocation5 + $0x428] sm:$0xff] }
  0x53   :  { %578 = vmatpush1.bf16.msra.mxu1 %v577_v6  ;;  %v663_v4 = vpack.c.bf16 %v192_v1, %v190_v0  ;;  %v191_v6 = vld [vmem:[#allocation5 + $0x410] sm:$0xff]  ;;  %v198_v15 = vld [vmem:[#allocation5 + $0x448] sm:$0xff]  ;;  %v200_v16 = vld [vmem:[#allocation5 + $0x458] sm:$0xff] }
  0x54   :  { %642 = vmatpush1.bf16.msra.mxu0 %v641_v8  ;;  %580 = vmatprep.subr.bf16.mxu1 %v579_v9  ;;  %v196_v8 = vld [vmem:[#allocation5 + $0x438] sm:$0xff]  ;;  %v49_v9 = vld [vmem:[#allocation3] sm:$0xff]  ;;  %v665_v10 = vpack.c.bf16 %v191_v6, %v189_v5  ;;  %v51_v11 = vld [vmem:[#allocation3 + $0x10] sm:$0xff] }
  0x55   :  { %644 = vmatprep.subr.bf16.mxu0 %v643_v13  ;;  %v667_v12 = vpack.c.bf16 %v196_v8, %v194_v7  ;;  %v193_v13 = vld [vmem:[#allocation5 + $0x420] sm:$0xff]  ;;  %v195_v14 = vld [vmem:[#allocation5 + $0x430] sm:$0xff]  ;;  %v56_v17 = vld [vmem:[#allocation3 + $0x38] sm:$0xff] }
  0x56   :  { %v669_v18 = vpack.c.bf16 %v195_v14, %v193_v13  ;;  %v55_v19 = vld [vmem:[#allocation3 + $0x30] sm:$0xff]  ;;  %v57_v24 = vld [vmem:[#allocation3 + $0x40] sm:$0xff]  ;;  %v202_v25 = vld [vmem:[#allocation5 + $0x468] sm:$0xff] }
  0x57   :  { %582 = vmatpush1.bf16.msra.mxu1 %v581_v20  ;;  %v58_v20 = vld [vmem:[#allocation3 + $0x48] sm:$0xff]  ;;  %v199_v23 = vld [vmem:[#allocation5 + $0x450] sm:$0xff]  ;;  %v60_v29 = vld [vmem:[#allocation3 + $0x58] sm:$0xff] }
  0x58   :  { %646 = vmatpush1.bf16.msra.mxu0 %v645_v21  ;;  %584 = vmatprep.subr.bf16.mxu1 %v583_v22  ;;  %v671_v21 = vpack.c.bf16 %v200_v16, %v198_v15  ;;  %v197_v22 = vld [vmem:[#allocation5 + $0x440] sm:$0xff]  ;;  %v54_v27 = vld [vmem:[#allocation3 + $0x28] sm:$0xff]  ;;  %v212_v40 = vld [vmem:[#allocation5 + $0x4b8] sm:$0xff] }
  0x59   :  { %648 = vmatprep.subr.bf16.mxu0 %v647_v26  ;;  %v204_v26 = vld [vmem:[#allocation5 + $0x478] sm:$0xff]  ;;  %v673_v28 = vpack.c.bf16 %v199_v23, %v197_v22  ;;  %v201_v31 = vld [vmem:[#allocation5 + $0x460] sm:$0xff]  ;;  %v210_v39 = vld [vmem:[#allocation5 + $0x4a8] sm:$0xff] }
  0x5a   :  { %v675_v30 = vpack.c.bf16 %v204_v26, %v202_v25  ;;  %v205_v37 = vld [vmem:[#allocation5 + $0x480] sm:$0xff]  ;;  %v683_v42 = vpack.c.bf16 %v212_v40, %v210_v39  ;;  %v218_v51 = vld [vmem:[#allocation5 + $0x4e8] sm:$0xff]  ;;  %v220_v52 = vld [vmem:[#allocation5 + $0x4f8] sm:$0xff] }
  0x5b   :  { %586 = vmatpush1.bf16.msra.mxu1 %v585_v32  ;;  %v203_v32 = vld [vmem:[#allocation5 + $0x470] sm:$0xff]  ;;  %v209_v43 = vld [vmem:[#allocation5 + $0x4a0] sm:$0xff]  ;;  %v691_v54 = vpack.c.bf16 %v220_v52, %v218_v51  ;;  %v226_v63 = vld [vmem:[#allocation5 + $0x528] sm:$0xff] }
  0x5c   :  { %650 = vmatpush1.bf16.msra.mxu0 %v649_v33  ;;  %588 = vmatprep.subr.bf16.mxu1 %v587_v34  ;;  %v206_v33 = vld [vmem:[#allocation5 + $0x488] sm:$0xff]  ;;  %v208_v34 = vld [vmem:[#allocation5 + $0x498] sm:$0xff]  ;;  %v677_v35 = vpack.c.bf16 %v203_v32, %v201_v31  ;;  %v213_v49 = vld [vmem:[#allocation5 + $0x4c0] sm:$0xff] }
  0x5d   :  { %652 = vmatprep.subr.bf16.mxu0 %v651_v38  ;;  %v679_v36 = vpack.c.bf16 %v208_v34, %v206_v33  ;;  %v207_v38 = vld [vmem:[#allocation5 + $0x490] sm:$0xff]  ;;  %v217_v55 = vld [vmem:[#allocation5 + $0x4e0] sm:$0xff]  ;;  %v228_v0 = vld [vmem:[#allocation5 + $0x538] sm:$0xff] }
  0x5e   :  { %v681_v41 = vpack.c.bf16 %v207_v38, %v205_v37  ;;  %v221_v61 = vld [vmem:[#allocation5 + $0x500] sm:$0xff]  ;;  %v230_v5 = vld [vmem:[#allocation5 + $0x548] sm:$0xff]  ;;  %v232_v6 = vld [vmem:[#allocation5 + $0x558] sm:$0xff] }
  0x5f   :  { %590 = vmatpush1.bf16.msra.mxu1 %v589_v44  ;;  %v211_v44 = vld [vmem:[#allocation5 + $0x4b0] sm:$0xff]  ;;  %v703_v8 = vpack.c.bf16 %v232_v6, %v230_v5  ;;  %v233_v15 = vld [vmem:[#allocation5 + $0x560] sm:$0xff]  ;;  %v242_v23 = vld [vmem:[#allocation5 + $0x5a8] sm:$0xff] }
  0x60   :  { %654 = vmatpush1.bf16.msra.mxu0 %v653_v45  ;;  %592 = vmatprep.subr.bf16.mxu1 %v591_v46  ;;  %v214_v45 = vld [vmem:[#allocation5 + $0x4c8] sm:$0xff]  ;;  %v216_v46 = vld [vmem:[#allocation5 + $0x4d8] sm:$0xff]  ;;  %v685_v47 = vpack.c.bf16 %v211_v44, %v209_v43  ;;  %v235_v16 = vld [vmem:[#allocation5 + $0x570] sm:$0xff]  ;;  %v255_v44 = vlaneseq }
  0x61   :  { %656 = vmatprep.subr.bf16.mxu0 %v655_v50  ;;  %v687_v48 = vpack.c.bf16 %v216_v46, %v214_v45  ;;  %v215_v50 = vld [vmem:[#allocation5 + $0x4d0] sm:$0xff]  ;;  %v245_v33 = vld [vmem:[#allocation5 + $0x5c0] sm:$0xff] }
  0x62   :  { %v689_v53 = vpack.c.bf16 %v215_v50, %v213_v49  ;;  %v239_v22 = vld [vmem:[#allocation5 + $0x590] sm:$0xff]  ;;  %v249_v39 = vld [vmem:[#allocation5 + $0x5e0] sm:$0xff]  ;;  %v256_v45 = vshrl.u32 %v255_v44, 7 }
  0x63   :  { %594 = vmatpush1.bf16.msra.mxu1 %v593_v56  ;;  %v219_v56 = vld [vmem:[#allocation5 + $0x4f0] sm:$0xff]  ;;  %v53_v43 = vld [vmem:[#allocation3 + $0x20] sm:$0xff] }
  0x64   :  { %658 = vmatpush1.bf16.msra.mxu0 %v657_v57  ;;  %596 = vmatprep.subr.bf16.mxu1 %v595_v58  ;;  %v222_v57 = vld [vmem:[#allocation5 + $0x508] sm:$0xff]  ;;  %v224_v58 = vld [vmem:[#allocation5 + $0x518] sm:$0xff]  ;;  %v693_v59 = vpack.c.bf16 %v219_v56, %v217_v55  ;;  %v247_v34 = vld [vmem:[#allocation5 + $0x5d0] sm:$0xff]  ;;  %v257_v46 = vsub.s32 0, %v256_v45  ;;  %v261_v49 = vsub.s32 1, %v256_v45 }
  0x65   :  { %660 = vmatprep.subr.bf16.mxu0 %v659_v62  ;;  %v695_v60 = vpack.c.bf16 %v224_v58, %v222_v57  ;;  %v223_v62 = vld [vmem:[#allocation5 + $0x510] sm:$0xff]  ;;  %v721_v37 = vpack.c.bf16 %v247_v34, %v245_v33 }
  0x66   :  { %v697_v1 = vpack.c.bf16 %v223_v62, %v221_v61  ;;  %v251_v40 = vld [vmem:[#allocation5 + $0x5f0] sm:$0xff]  ;;  %v500_v61 = vld [vmem:[%s903_s3] sm:$0x3] }
  0x67   :  { %598 = vmatpush1.bf16.msra.mxu1 %v597_v2  ;;  %v699_v2 = vpack.c.bf16 %v228_v0, %v226_v63 }
  0x68   :  { %662 = vmatpush1.bf16.msra.mxu0 %v661_v3  ;;  %727 = vmatprep.subr.bf16.mxu1 %v663_v4  ;;  %v225_v3 = vld [vmem:[#allocation5 + $0x520] sm:$0xff] }
  0x69   :  { %664 = vmatprep.subr.bf16.mxu0 %v663_v4  ;;  %v227_v4 = vld [vmem:[#allocation5 + $0x530] sm:$0xff] }
  0x6a   :  { %330 = vmatmul.mubr.f32.vlgmr.msra.gmra.mrb[0].mxu1 %v49_v9  ;;  %v701_v7 = vpack.c.bf16 %v227_v4, %v225_v3  ;;  %v229_v9 = vld [vmem:[#allocation5 + $0x540] sm:$0xff]  ;;  %v505_v3 = vrot.slane %v500_v61, %v257_v46 }
  0x6b   :  { %407 = vmatmul.mubr.f32.vlgmr.msra.gmra.mrb[0].mxu0 %v51_v11  ;;  %743 = vmatpush1.bf16.msra.mxu1 %v665_v10  ;;  %v234_v11 = vld [vmem:[#allocation5 + $0x568] sm:$0xff] }
  0x6c   :  { %666 = vmatpush1.bf16.msra.mxu0 %v665_v10  ;;  %728 = vmatprep.subr.bf16.mxu1 %v667_v12  ;;  %v231_v10 = vld [vmem:[#allocation5 + $0x550] sm:$0xff] }
  0x6d   :  { %668 = vmatprep.subr.bf16.mxu0 %v667_v12  ;;  %335 = vmatprep.mubr.f32.mxu1 %v56_v17  ;;  %v236_v12 = vld [vmem:[#allocation5 + $0x578] sm:$0xff]  ;;  %v705_v13 = vpack.c.bf16 %v231_v10, %v229_v9  ;;  %v238_v17 = vld [vmem:[#allocation5 + $0x588] sm:$0xff] }
  0x6e   :  { %336 = vmatmul.mubr.f32.gmra.mrb[2].mxu1 %v55_v19  ;;  %412 = vmatprep.mubr.f32.mxu0 %v58_v20  ;;  %v707_v14 = vpack.c.bf16 %v236_v12, %v234_v11  ;;  %v709_v19 = vpack.c.bf16 %v235_v16, %v233_v15 }
  0x6f   :  { %744 = vmatpush1.bf16.msra.mxu1 %v669_v18  ;;  %413 = vmatmul.mubr.f32.gmra.mrb[2].mxu0 %v57_v24  ;;  %v244_v24 = vld [vmem:[#allocation5 + $0x5b8] sm:$0xff] }
  0x70   :  { %670 = vmatpush1.bf16.msra.mxu0 %v669_v18  ;;  %729 = vmatprep.subr.bf16.mxu1 %v671_v21  ;;  %v240_v18 = vld [vmem:[#allocation5 + $0x598] sm:$0xff]  ;;  %v715_v26 = vpack.c.bf16 %v244_v24, %v242_v23 }
  0x71   :  { %672 = vmatprep.subr.bf16.mxu0 %v671_v21  ;;  %483 = vmatprep.mubr.f32.mxu0 %v54_v27  ;;  %v711_v20 = vpack.c.bf16 %v240_v18, %v238_v17  ;;  %v237_v21 = vld [vmem:[#allocation5 + $0x580] sm:$0xff] }
  0x72   :  { %489 = vmatprep.mubr.f32.mxu1 %v60_v29  ;;  %v713_v25 = vpack.c.bf16 %v239_v22, %v237_v21  ;;  %v241_v27 = vld [vmem:[#allocation5 + $0x5a0] sm:$0xff]  ;;  %v246_v29 = vld [vmem:[#allocation5 + $0x5c8] sm:$0xff] }
  0x73   :  { %745 = vmatpush1.bf16.msra.mxu1 %v673_v28 }
  0x74   :  { %674 = vmatpush1.bf16.msra.mxu0 %v673_v28  ;;  %730 = vmatprep.subr.bf16.mxu1 %v675_v30  ;;  %v243_v28 = vld [vmem:[#allocation5 + $0x5b0] sm:$0xff] }
  0x75   :  { %676 = vmatprep.subr.bf16.mxu0 %v675_v30  ;;  %v248_v30 = vld [vmem:[#allocation5 + $0x5d8] sm:$0xff]  ;;  %v717_v31 = vpack.c.bf16 %v243_v28, %v241_v27 }
  0x76   :  { %v719_v32 = vpack.c.bf16 %v248_v30, %v246_v29 }
  0x77   :  { %746 = vmatpush1.bf16.msra.mxu1 %v677_v35 }
  0x78   :  { %678 = vmatpush1.bf16.msra.mxu0 %v677_v35  ;;  %731 = vmatprep.subr.bf16.mxu1 %v679_v36  ;;  %v250_v35 = vld [vmem:[#allocation5 + $0x5e8] sm:$0xff] }
  0x79   :  { %680 = vmatprep.subr.bf16.mxu0 %v679_v36  ;;  %v252_v36 = vld [vmem:[#allocation5 + $0x5f8] sm:$0xff] }
  0x7a   :  { %v723_v38 = vpack.c.bf16 %v252_v36, %v250_v35 }
  0x7b   :  { %747 = vmatpush1.bf16.msra.mxu1 %v681_v41 }
  0x7c   :  { %682 = vmatpush1.bf16.msra.mxu0 %v681_v41  ;;  %732 = vmatprep.subr.bf16.mxu1 %v683_v42  ;;  %v725_v41 = vpack.c.bf16 %v251_v40, %v249_v39 }
  0x7d   :  { %684 = vmatprep.subr.bf16.mxu0 %v683_v42  ;;  %v59_v42 = vld [vmem:[#allocation3 + $0x50] sm:$0xff] }
  0x7f   :  { %748 = vmatpush1.bf16.msra.mxu1 %v685_v47 }
  0x80   :  { %686 = vmatpush1.bf16.msra.mxu0 %v685_v47  ;;  %733 = vmatprep.subr.bf16.mxu1 %v687_v48  ;;  %v253_v47 = vld [vmem:[%s902_s2] sm:$0x3] }
  0x81   :  { %688 = vmatprep.subr.bf16.mxu0 %v687_v48  ;;  %v258_v51 = vrot.slane %v253_v47, %v257_v46  ;;  %v262_v52 = vrot.slane %v253_v47, %v261_v49 }
  0x83   :  { %749 = vmatpush1.bf16.msra.mxu1 %v689_v53 }
  0x84   :  { %690 = vmatpush1.bf16.msra.mxu0 %v689_v53  ;;  %734 = vmatprep.subr.bf16.mxu1 %v691_v54 }
  0x85   :  { %692 = vmatprep.subr.bf16.mxu0 %v691_v54 }
  0x87   :  { %750 = vmatpush1.bf16.msra.mxu1 %v693_v59 }
  0x88   :  { %694 = vmatpush1.bf16.msra.mxu0 %v693_v59  ;;  %735 = vmatprep.subr.bf16.mxu1 %v695_v60 }
  0x89   :  { %696 = vmatprep.subr.bf16.mxu0 %v695_v60 }
  0x8b   :  { %751 = vmatpush1.bf16.msra.mxu1 %v697_v1 }
  0x8c   :  { %698 = vmatpush1.bf16.msra.mxu0 %v697_v1  ;;  %736 = vmatprep.subr.bf16.mxu1 %v699_v2 }
  0x8d   :  { %700 = vmatprep.subr.bf16.mxu0 %v699_v2 }
  0x8f   :  { %752 = vmatpush1.bf16.msra.mxu1 %v701_v7 }
  0x90   :  { %702 = vmatpush1.bf16.msra.mxu0 %v701_v7  ;;  %737 = vmatprep.subr.bf16.mxu1 %v703_v8 }
  0x91   :  { %704 = vmatprep.subr.bf16.mxu0 %v703_v8  ;;  %v509_v8 = vrot.slane %v500_v61, %v261_v49 }
  0x93   :  { %753 = vmatpush1.bf16.msra.mxu1 %v705_v13 }
  0x94   :  { %706 = vmatpush1.bf16.msra.mxu0 %v705_v13  ;;  %738 = vmatprep.subr.bf16.mxu1 %v707_v14 }
  0x95   :  { %708 = vmatprep.subr.bf16.mxu0 %v707_v14 }
  0x97   :  { %754 = vmatpush1.bf16.msra.mxu1 %v709_v19 }
  0x98   :  { %710 = vmatpush1.bf16.msra.mxu0 %v709_v19  ;;  %739 = vmatprep.subr.bf16.mxu1 %v711_v20 }
  0x99   :  { %712 = vmatprep.subr.bf16.mxu0 %v711_v20  ;;  %v523_v20 = vstv %s904_s4 }
  0x9b   :  { %755 = vmatpush1.bf16.msra.mxu1 %v713_v25 }
  0x9c   :  { %714 = vmatpush1.bf16.msra.mxu0 %v713_v25  ;;  %740 = vmatprep.subr.bf16.mxu1 %v715_v26 }
  0x9d   :  { %716 = vmatprep.subr.bf16.mxu0 %v715_v26 }
  0x9f   :  { %756 = vmatpush1.bf16.msra.mxu1 %v717_v31 }
  0xa0   :  { %718 = vmatpush1.bf16.msra.mxu0 %v717_v31  ;;  %741 = vmatprep.subr.bf16.mxu1 %v719_v32 }
  0xa1   :  { %720 = vmatprep.subr.bf16.mxu0 %v719_v32 }
  0xa3   :  { %757 = vmatpush1.bf16.msra.mxu1 %v721_v37 }
  0xa4   :  { %722 = vmatpush1.bf16.msra.mxu0 %v721_v37  ;;  %742 = vmatprep.subr.bf16.mxu1 %v723_v38 }
  0xa5   :  { %724 = vmatprep.subr.bf16.mxu0 %v723_v38 }
  0xa7   :  { %758 = vmatpush1.bf16.msra.mxu1 %v725_v41 }
  0xa8   :  { %726 = vmatpush1.bf16.msra.mxu0 %v725_v41 }
  0xaa   :  { %490 = vmatmul.mubr.f32.vlgmr.msra.gmra.mrb[4].mxu1 %v59_v42 }
  0xab   :  { %484 = vmatmul.mubr.f32.vlgmr.msra.gmra.mrb[0].mxu0 %v53_v43 }
 0x13d   :  { %v331_v48 = vpop.f32.mrb[0].mxu1 }
 0x13e   :  { %v333_v50 = vpop.f32.mrb[1].mxu1  ;;  %v332_v62 = vadd.f32 %v331_v48, %v258_v51 }
 0x13f   :  { %v334_v0 = vadd.f32 %v333_v50, %v262_v52 }
 0x141   :  { %v337_v53 = vpop.f32.mrb[2].mxu1 }
 0x142   :  { %v338_v54 = vadd.f32 %v337_v53, %v258_v51  ;;  %v339_v55 = vpop.f32.mrb[3].mxu1  ;;  %v414_v56 = vpop.f32.mrb[2].mxu0 }
 0x143   :  { %v340_v57 = vadd.f32 %v339_v55, %v262_v52  ;;  %v416_v58 = vpop.f32.mrb[3].mxu0 }
 0x144   :  { %v415_v59 = vadd.f32 %v414_v56, %v338_v54 }
 0x145   :  { %v417_v60 = vadd.f32 %v416_v58, %v340_v57 }
 0x17d   :  { %v491_v63 = vpop.f32.mrb[4].mxu1 }
 0x17e   :  { %v485_v1 = vpop.f32.mrb[0].mxu0  ;;  %v492_v2 = vadd.f32 %v491_v63, %v415_v59  ;;  %v493_v4 = vpop.f32.mrb[5].mxu1 }
 0x17f   :  { %v760_v5 = vadd.f32 %v485_v1, %v332_v62  ;;  %v487_v6 = vpop.f32.mrb[1].mxu0  ;;  %v494_v7 = vadd.f32 %v493_v4, %v417_v60 }
 0x180   :  { %v498_v9 = vmax.f32 %v492_v2, 0.0  ;;  %v762_v10 = vadd.f32 %v487_v6, %v334_v0 }
 0x181   :  { %v496_v11 = vmax.f32 %v760_v5, 0.0  ;;  %v499_v12 = vmax.f32 %v494_v7, 0.0 }
 0x182   :  { %v514_v13 = vmul.f32 %v505_v3, %v498_v9  ;;  %v497_v14 = vmax.f32 %v762_v10, 0.0 }
 0x183   :  { %v515_v15 = vmul.f32 %v509_v8, %v499_v12  ;;  %v512_v16 = vmul.f32 %v505_v3, %v496_v11 }
 0x184   :  { %v513_v17 = vmul.f32 %v509_v8, %v497_v14 }
 0x185   :  { %v519_v18 = vadd.f32 %v515_v15, %v514_v13 }
 0x186   :  { %v516_v19 = vadd.f32 %v513_v17, %v512_v16 }
 0x188   :  { %517 = vadd.xlane.f32.xlu0 %v516_v19 }
 0x18c   :  { %520 = vadd.xlane.f32.xlu0 %v519_v18 }
 0x215   :  { %v518_v21 = vpop.xlane.xlu0 %517 }
 0x216   :  { %v524_v22 = vadd.f32 %v523_v20, %v518_v21 }
 0x218   :  { %527 = vst.msk [vmem:[%s905_s5] sm:$0xff] %vm526_vm0, %v524_v22 }
 0x219   :  { %v521_v23 = vpop.xlane.xlu0 %520 }
 0x21a   :  { %v525_v24 = vadd.f32 %v523_v20, %v521_v23 }
 0x21c   :  { %528 = vst.msk [vmem:[%s905_s5 + $0x8] sm:$0xff] %vm526_vm0, %v525_v24 }
 0x21d   :  { %533 = vsyncpa [#allocation4], 1 }
 0x21e   :  { %534 = vsyncpa [#allocation6], 1 }

</bundles_post_ra>
